<compile_context>
chip_gen: v7x
topology: tpu7x:2x2x1
jax: 0.10.0
libtpu: 0.0.40
codegen_flags: <defaults>
</compile_context>

<pallas_src>
import jax
import jax.numpy as jnp
from jax.experimental import pallas as pl
from jax.experimental.pallas import tpu as pltpu

PACK = 8  # rows of x folded into one lane-dense packed row


def _logreg_kernel(x_ref, w_ref, b_ref, o_ref):
    # x_ref: (tile, PACK*hid)  w_ref: (PACK*hid, PACK*out)  b_ref: (1, PACK*out)
    # o_ref: (tile, PACK*out) -- all lane-dense blocks, plain MXU matmul.
    acc = jnp.dot(x_ref[...], w_ref[...], preferred_element_type=jnp.float32)
    o_ref[...] = (acc + b_ref[...]).astype(o_ref.dtype)


def _choose_tile_rows(n_rows, max_tile):
    """Pick the packed-row tile: as big as the VMEM budget allows, multiple of
    8 (or the full extent), and split into >=2 steps for v7x megacore when the
    whole problem would otherwise fit in one step."""
    tile = min(max_tile, n_rows)
    if tile == n_rows and n_rows >= 64:
        half = ((n_rows + 1) // 2 + 7) // 8 * 8
        if half < n_rows:
            tile = half
    return tile


def logreg_forward(x, weight, bias, *, vmem_working_set_bytes=12 << 20):
    """x: (N, hid) f32, weight: (out, hid) f32, bias: (out,) f32 -> (N, out)."""
    N, hid = x.shape
    out_dim, hid_w = weight.shape
    assert hid == hid_w, "weight shape must be (out_dim, hid_dim)"

    # --- wrapper-side lane packing (one-time layout plumbing, not compute) ---
    pad = (-N) % PACK
    if pad:
        x = jnp.pad(x, ((0, pad), (0, 0)))
    n_pad = N + pad
    n_rows = n_pad // PACK
    hid_p = hid * PACK          # packed input lanes (256 for hid=32)
    out_p = out_dim * PACK      # packed output lanes (128 for out=16)

    x_packed = x.reshape(n_rows, hid_p)
    # Block-diagonal packed weight: kron(I_PACK, W^T), built once per call.
    w_packed = jnp.kron(jnp.eye(PACK, dtype=weight.dtype), weight.T)  # (hid_p, out_p)
    b_packed = jnp.tile(bias, PACK).reshape(1, out_p)

    # --- tile sizing: double-buffered x + out tiles within the VMEM budget ---
    bytes_per_packed_row = 4 * (hid_p + out_p)
    max_tile = max(8, (vmem_working_set_bytes // (2 * bytes_per_packed_row)) // 8 * 8)
    tile = _choose_tile_rows(n_rows, max_tile)
    grid = (pl.cdiv(n_rows, tile),)

    flops = 2 * n_rows * hid_p * out_p
    bytes_accessed = 4 * (n_rows * hid_p + hid_p * out_p + out_p + n_rows * out_p)

    out_packed = pl.pallas_call(
        _logreg_kernel,
        out_shape=jax.ShapeDtypeStruct((n_rows, out_p), x.dtype),
        grid=grid,
        in_specs=[
            # x: one lane-dense row tile per step (pipelined / double-buffered).
            pl.BlockSpec((tile, hid_p), lambda i: (i, 0)),
            # weight & bias: same block every step -> stay resident in VMEM.
            pl.BlockSpec((hid_p, out_p), lambda i: (0, 0)),
            pl.BlockSpec((1, out_p), lambda i: (0, 0)),
        ],
        out_specs=pl.BlockSpec((tile, out_p), lambda i: (i, 0)),
        compiler_params=pltpu.CompilerParams(
            dimension_semantics=("parallel",),
            vmem_limit_bytes=32 << 20),
        cost_estimate=pl.CostEstimate(
            flops=flops, transcendentals=0, bytes_accessed=bytes_accessed),
    )(x_packed, w_packed, b_packed)

    out = out_packed.reshape(n_pad, out_dim)
    if pad:
        out = out[:N]
    return out


if __name__ == "__main__":
    # Small shapes implied by the module: hid_dim=32, out_dim=16, batch N=8.
    N, hid_dim, out_dim = 8, 32, 16

    key = jax.random.PRNGKey(0)
    kx, kw = jax.random.split(key)

    # Deterministic params matching __init__:
    #  - xavier_uniform_ on weight: U(-a, a), a = sqrt(6 / (fan_in + fan_out))
    #  - bias filled with 0.0
    bound = (6.0 / (hid_dim + out_dim)) ** 0.5
    weight = jax.random.uniform(
        kw, (out_dim, hid_dim), dtype=jnp.float32, minval=-bound, maxval=bound)
    bias = jnp.zeros((out_dim,), dtype=jnp.float32)

    x = jax.random.normal(kx, (N, hid_dim), dtype=jnp.float32)

    out = logreg_forward(x, weight, bias)
    jax.block_until_ready(out)

    # Reference check (plain JAX, same semantics as torch nn.Linear).
    ref = x @ weight.T + bias
    assert out.shape == (N, out_dim)
    assert jnp.allclose(out, ref, atol=1e-5, rtol=1e-5)

    print("KERNEL_OK")
</pallas_src>

<mosaic_0001>
module attributes {stable_mosaic.version = 11 : i64} {
  func.func @_logreg_kernel(%arg0: i32, %arg1: memref<1x256xf32, #tpu.memory_space<vmem>>, %arg2: memref<256x128xf32, #tpu.memory_space<vmem>>, %arg3: memref<1x128xf32, #tpu.memory_space<vmem>>, %arg4: memref<1x128xf32, #tpu.memory_space<vmem>>) attributes {dimension_semantics = [#tpu.dimension_semantics<parallel>], iteration_bounds = array<i64: 1>, scalar_prefetch = 0 : i64, scratch_operands = 0 : i64, tpu.core_type = #tpu.core_type<tc>, window_params = [{transform_indices = @transform_0, window_bounds = array<i64: 1, 256>}, {pipeline_mode = #tpu.pipeline_mode<synchronous>, transform_indices = @transform_1, window_bounds = array<i64: 256, 128>}, {pipeline_mode = #tpu.pipeline_mode<synchronous>, transform_indices = @transform_2, window_bounds = array<i64: 1, 128>}, {transform_indices = @transform_3, window_bounds = array<i64: 1, 128>}]} {
    %c0 = arith.constant 0 : index
    %c0_0 = arith.constant 0 : index
    %0 = vector.load %arg1[%c0, %c0_0] : memref<1x256xf32, #tpu.memory_space<vmem>>, vector<1x256xf32>
    %c0_1 = arith.constant 0 : index
    %c0_2 = arith.constant 0 : index
    %1 = vector.load %arg2[%c0_1, %c0_2] : memref<256x128xf32, #tpu.memory_space<vmem>>, vector<256x128xf32>
    %cst = arith.constant dense<0.000000e+00> : vector<1x128xf32>
    %2 = tpu.matmul %0, %1, %cst {dimension_numbers = #tpu.dot_dimension_numbers<[1], [0], [0], [1], [0, 0, 1, 1], [], []>} : vector<1x256xf32>, vector<256x128xf32>, vector<1x128xf32> -> vector<1x128xf32>
    %c0_3 = arith.constant 0 : index
    %c0_4 = arith.constant 0 : index
    %3 = vector.load %arg3[%c0_3, %c0_4] : memref<1x128xf32, #tpu.memory_space<vmem>>, vector<1x128xf32>
    %4 = arith.addf %2, %3 : vector<1x128xf32>
    %c0_5 = arith.constant 0 : index
    %c0_6 = arith.constant 0 : index
    %5 = vector.load %arg4[%c0_5, %c0_6] : memref<1x128xf32, #tpu.memory_space<vmem>>, vector<1x128xf32>
    tpu.vector_store %arg4[%c0_5, %c0_6], %4 {strides = array<i32>} : memref<1x128xf32, #tpu.memory_space<vmem>>, vector<1x128xf32>,
    return
  }
  func.func @transform_0(%arg0: i32) -> (i32, i32) {
    %c0_i32 = arith.constant 0 : i32
    %c0_i32_0 = arith.constant 0 : i32
    return %arg0, %c0_i32 : i32, i32
  }
  func.func @transform_1(%arg0: i32) -> (i32, i32) {
    %c0_i32 = arith.constant 0 : i32
    %c0_i32_0 = arith.constant 0 : i32
    %c0_i32_1 = arith.constant 0 : i32
    return %c0_i32, %c0_i32_0 : i32, i32
  }
  func.func @transform_2(%arg0: i32) -> (i32, i32) {
    %c0_i32 = arith.constant 0 : i32
    %c0_i32_0 = arith.constant 0 : i32
    %c0_i32_1 = arith.constant 0 : i32
    return %c0_i32, %c0_i32_0 : i32, i32
  }
  func.func @transform_3(%arg0: i32) -> (i32, i32) {
    %c0_i32 = arith.constant 0 : i32
    %c0_i32_0 = arith.constant 0 : i32
    return %arg0, %c0_i32 : i32, i32
  }
}

</mosaic_0001>

<bundles_post_ra>
// kernel: tpu_custom_call.1
= control target key start
LH: loop header
LB: loop body
LE: loop exit
PB: predicated region body
PF: predicated region fallthrough
CT: control target
= control target key end

     0   :  { %8 = vsyncpa [#allocation3], 0  ;;  %s388_s0 = inlined_call_operand.hbm [shape: f32[1,256], index: 0, kind: input, shape index: {}]   ;;  %s389_s1 = inlined_call_operand.hbm [shape: f32[256,128], index: 1, kind: input, shape index: {}]   ;;  %s390_s2 = inlined_call_operand.vmem [shape: f32[1,128], index: 2, kind: input, shape index: {}]   ;;  %s391_s3 = inlined_call_operand.hbm [shape: f32[1,128], index: 3, kind: output, shape index: {}]  }
   0x1   :  { %9 = vsyncpa [#allocation6], 0 }
   0x2   :  { %10 = vsyncpa [#allocation4], 0  ;;  %s317_s12 = smov [#allocation2]   ;;  %s318_s14 = smov [#allocation5]  }
   0x3   :  { %s17_s13 = sshll.u32 %s317_s12, 4  ;;  %s26_s15 = sshll.u32 %s318_s14, 4  ;;  %s18_s13 = int_to_ptr.vmem [resolvable:$true] %s17_s13  ;;  %s342_s15 = int_to_ptr.vmem [resolvable:$true] %s26_s15 }
   0x4   :  { %s245_s18 = scalar_lea.hbm %s388_s0, 32 }
   0x5   :  { %p246_p0 = scmp.ne.s32.totalorder %s388_s0, %s245_s18  ;;  %p249_p1 = scmp.lt.u32.totalorder %s245_s18, %s388_s0 }
   0x7   :  { %p251_p2 = pnand %p249_p1, %p246_p0 }
   0x9   :  { %254 = shalt.err (!%p251_p2)
}
   0xa   :  { %s255_s23 = scalar_lea.vmem %s18_s13, 32  ;;  %p260_p4 = scmp.lt.s32.totalorder %s18_s13, %s18_s13 }
   0xb   :  { %p256_p3 = scmp.ne.s32.totalorder %s18_s13, %s255_s23  ;;  %p261_p5 = scmp.lt.s32.totalorder %s255_s23, %s255_s23 }
   0xd   :  { %p262_p6 = por %p261_p5, %p260_p4 }
   0xf   :  { %p263_p7 = pnand %p262_p6, %p256_p3 }
  0x11   :  { %266 = shalt.err (!%p263_p7)
}
  0x12   :  { %20 = dma.hbm_to_vmem [thread:$0]  %s388_s0, 32, %s18_s13, [#allocation3]  }
  0x13   :  { %s267_s28 = scalar_lea.hbm %s389_s1, 4096 }
  0x14   :  { %p268_p8 = scmp.ne.s32.totalorder %s389_s1, %s267_s28  ;;  %p271_p9 = scmp.lt.u32.totalorder %s267_s28, %s389_s1 }
  0x16   :  { %p273_p10 = pnand %p271_p9, %p268_p8 }
  0x18   :  { %276 = shalt.err (!%p273_p10)
}
  0x19   :  { %s277_s6 = scalar_lea.vmem %s342_s15, 4096  ;;  %p282_p12 = scmp.lt.s32.totalorder %s342_s15, %s342_s15 }
  0x1a   :  { %p278_p11 = scmp.ne.s32.totalorder %s342_s15, %s277_s6  ;;  %p283_p13 = scmp.lt.s32.totalorder %s277_s6, %s277_s6 }
  0x1c   :  { %p284_p0 = por %p283_p13, %p282_p12 }
  0x1e   :  { %p285_p1 = pnand %p284_p0, %p278_p11 }
  0x20   :  { %288 = shalt.err (!%p285_p1)
}
  0x21   :  { %s319_s0 = smov 128   ;;  %s320_s7 = smov 8  }
  0x22   :  { %32 = dma.hbm_to_vmem [thread:$0]  %s389_s1, 4096, %s342_s15, [#allocation6], %s319_s0, %s319_s0, %s320_s7  }
  0x23   :  { %311 = dma.done.wait [#allocation3], 32  }
  0x24   :  { %312 = vsyncadd [#allocation3], 4294967264 }
  0x25   :  { %313 = dma.done.wait [#allocation6], 4096  }
  0x26   :  { %314 = vsyncadd [#allocation6], 4294963200  ;;  %v76_v0 = vlaneseq  ;;  %v58_v1 = vld [vmem:[#allocation5 + $0x80] sm:$0xff]  ;;  %v59_v2 = vld [vmem:[#allocation5 + $0x88] sm:$0xff]  ;;  %s321_s11 = smov [#allocation7]  }
  0x27   :  { %v42_v3 = vld [vmem:[#allocation5] sm:$0xff]  ;;  %v208_v4 = vpack.c.bf16 %v59_v2, %v58_v1  ;;  %v43_v5 = vld [vmem:[#allocation5 + $0x8] sm:$0xff]  ;;  %v60_v6 = vld [vmem:[#allocation5 + $0x90] sm:$0xff]  ;;  %s163_s12 = sshll.u32 %s321_s11, 4  ;;  %s164_s12 = int_to_ptr.vmem [resolvable:$true] %s163_s12 }
  0x28   :  { %v61_v7 = vld [vmem:[#allocation5 + $0x98] sm:$0xff]  ;;  %v210_v8 = vpack.c.bf16 %v43_v5, %v42_v3  ;;  %v44_v10 = vld [vmem:[#allocation5 + $0x10] sm:$0xff]  ;;  %v62_v12 = vld [vmem:[#allocation5 + $0xa0] sm:$0xff]  ;;  %v77_v14 = vshrl.u32 %v76_v0, 7  ;;  %s289_s13 = scalar_lea.vmem %s164_s12, 16  ;;  %s293_s14 = scalar_lea.vmem %s164_s12, 32 }
  0x29   :  { %v212_v9 = vpack.c.bf16 %v61_v7, %v60_v6  ;;  %v45_v11 = vld [vmem:[#allocation5 + $0x18] sm:$0xff]  ;;  %209 = vmatprep.subr.bf16.mxu0 %v208_v4  ;;  %v63_v13 = vld [vmem:[#allocation5 + $0xa8] sm:$0xff]  ;;  %v46_v17 = vld [vmem:[#allocation5 + $0x20] sm:$0xff]  ;;  %p290_p2 = scmp.ne.s32.totalorder %s164_s12, %s289_s13  ;;  %p294_p3 = scmp.lt.s32.totalorder %s164_s12, %s164_s12 }
  0x2a   :  { %211 = vmatpush3.bf16.msra.mxu0 %v210_v8  ;;  %v214_v15 = vpack.c.bf16 %v45_v11, %v44_v10  ;;  %v216_v16 = vpack.c.bf16 %v63_v13, %v62_v12  ;;  %v47_v18 = vld [vmem:[#allocation5 + $0x28] sm:$0xff]  ;;  %v64_v19 = vld [vmem:[#allocation5 + $0xb0] sm:$0xff]  ;;  %v65_v20 = vld [vmem:[#allocation5 + $0xb8] sm:$0xff]  ;;  %v82_v21 = vsub.s32 1, %v77_v14  ;;  %v78_v52 = vsub.s32 0, %v77_v14  ;;  %p295_p4 = scmp.lt.s32.totalorder %s293_s14, %s289_s13 }
  0x2b   :  { %213 = vmatprep.subr.bf16.mxu0 %v212_v9  ;;  %v218_v22 = vpack.c.bf16 %v47_v18, %v46_v17  ;;  %v220_v23 = vpack.c.bf16 %v65_v20, %v64_v19  ;;  %v48_v24 = vld [vmem:[#allocation5 + $0x30] sm:$0xff]  ;;  %v49_v25 = vld [vmem:[#allocation5 + $0x38] sm:$0xff]  ;;  %v66_v26 = vld [vmem:[#allocation5 + $0xc0] sm:$0xff] }
  0x2c   :  { %v67_v27 = vld [vmem:[#allocation5 + $0xc8] sm:$0xff]  ;;  %v41_v28 = vld [vmem:[#allocation2] sm:$0x3]  ;;  %v222_v30 = vpack.c.bf16 %v49_v25, %v48_v24  ;;  %v50_v32 = vld [vmem:[#allocation5 + $0x40] sm:$0xff]  ;;  %p296_p5 = por %p295_p4, %p294_p3 }
  0x2d   :  { %v83_v29 = vrot.slane %v41_v28, %v82_v21  ;;  %v224_v31 = vpack.c.bf16 %v67_v27, %v66_v26  ;;  %v51_v33 = vld [vmem:[#allocation5 + $0x48] sm:$0xff]  ;;  %v68_v34 = vld [vmem:[#allocation5 + $0xd0] sm:$0xff]  ;;  %v69_v35 = vld [vmem:[#allocation5 + $0xd8] sm:$0xff]  ;;  %v79_v54 = vrot.slane %v41_v28, %v78_v52 }
  0x2e   :  { %215 = vmatpush3.bf16.msra.mxu0 %v214_v15  ;;  %v226_v36 = vpack.c.bf16 %v51_v33, %v50_v32  ;;  %v228_v37 = vpack.c.bf16 %v69_v35, %v68_v34  ;;  %v52_v38 = vld [vmem:[#allocation5 + $0x50] sm:$0xff]  ;;  %v53_v39 = vld [vmem:[#allocation5 + $0x58] sm:$0xff]  ;;  %v70_v40 = vld [vmem:[#allocation5 + $0xe0] sm:$0xff]  ;;  %p297_p6 = pnand %p296_p5, %p290_p2 }
  0x2f   :  { %217 = vmatprep.subr.bf16.mxu0 %v216_v16  ;;  %150 = vmatprep.mubr.f32.mxu0 %v83_v29  ;;  %v71_v41 = vld [vmem:[#allocation5 + $0xe8] sm:$0xff]  ;;  %v230_v42 = vpack.c.bf16 %v53_v39, %v52_v38  ;;  %v54_v44 = vld [vmem:[#allocation5 + $0x60] sm:$0xff]  ;;  %v72_v46 = vld [vmem:[#allocation5 + $0xf0] sm:$0xff] }
  0x30   :  { %v232_v43 = vpack.c.bf16 %v71_v41, %v70_v40  ;;  %v55_v45 = vld [vmem:[#allocation5 + $0x68] sm:$0xff]  ;;  %v73_v47 = vld [vmem:[#allocation5 + $0xf8] sm:$0xff]  ;;  %v56_v50 = vld [vmem:[#allocation5 + $0x70] sm:$0xff] }
  0x31   :  { %v234_v48 = vpack.c.bf16 %v55_v45, %v54_v44  ;;  %v236_v49 = vpack.c.bf16 %v73_v47, %v72_v46  ;;  %v57_v51 = vld [vmem:[#allocation5 + $0x78] sm:$0xff] }
  0x32   :  { %219 = vmatpush3.bf16.msra.mxu0 %v218_v22  ;;  %v238_v53 = vpack.c.bf16 %v57_v51, %v56_v50  ;;  %v74_v56 = vld [vmem:[%s390_s2] sm:$0x1] }
  0x33   :  { %221 = vmatprep.subr.bf16.mxu0 %v220_v23 }
  0x36   :  { %223 = vmatpush3.bf16.msra.mxu0 %v222_v30 }
  0x37   :  { %225 = vmatprep.subr.bf16.mxu0 %v224_v31 }
  0x3a   :  { %227 = vmatpush3.bf16.msra.mxu0 %v226_v36 }
  0x3b   :  { %229 = vmatprep.subr.bf16.mxu0 %v228_v37 }
  0x3e   :  { %231 = vmatpush3.bf16.msra.mxu0 %v230_v42 }
  0x3f   :  { %233 = vmatprep.subr.bf16.mxu0 %v232_v43 }
  0x42   :  { %235 = vmatpush3.bf16.msra.mxu0 %v234_v48 }
  0x43   :  { %237 = vmatprep.subr.bf16.mxu0 %v236_v49 }
  0x46   :  { %239 = vmatpush3.bf16.msra.mxu0 %v238_v53 }
  0x49   :  { %151 = vmatmul.mubr.f32.vlgmr.msra.gmra.mrb[0].mxu0 %v79_v54 }
 0x11c   :  { %v205_v55 = vpop.f32.mrb[0].mxu0 }
 0x11d   :  { %v206_v57 = vpop.f32.mrb[1].mxu0 }
 0x11e   :  { %v207_v58 = vadd.f32 %v206_v57, %v205_v55 }
 0x120   :  { %v153_v59 = vadd.f32 %v207_v58, %v74_v56 }
 0x122   :  { %156 = vst [vmem:[#allocation7] sm:$0x1] %v153_v59 }
 0x123   :  { %300 = shalt.err (!%p297_p6)
}
 0x124   :  { %s301_s17 = scalar_lea.hbm %s391_s3, 16 }
 0x125   :  { %p302_p7 = scmp.ne.s32.totalorder %s391_s3, %s301_s17  ;;  %p305_p8 = scmp.lt.u32.totalorder %s301_s17, %s391_s3 }
 0x127   :  { %p307_p9 = pnand %p305_p8, %p302_p7 }
 0x129   :  { %310 = shalt.err (!%p307_p9)
}
 0x12a   :  { %166 = dma.vmem_to_hbm [thread:$0]  %s164_s12, 16, %s391_s3, [#allocation4]  }
 0x12b   :  { %315 = dma.done.wait [#allocation4], 16  }
 0x12c   :  { %316 = vsyncadd [#allocation4], 4294967280 }
 0x12d   :  { %170 = vsyncpa [#allocation3], 1 }
 0x12e   :  { %171 = vsyncpa [#allocation6], 1 }
 0x12f   :  { %172 = vsyncpa [#allocation4], 1 }

</bundles_post_ra>
